<compile_context>
chip_gen: v5e
topology: v5e:2x2
jax: 0.10.0
libtpu: 0.0.40
codegen_flags: <defaults>
</compile_context>

<pallas_src>
import functools

import jax
import jax.numpy as jnp
from jax import lax
from jax.experimental import pallas as pl
from jax.experimental.pallas import tpu as pltpu

LANES = 128
# 4096 * 128 * 4 B = 2 MiB per f32 input block; 2 inputs x 2 buffers = 8 MiB
# -> fits the default scoped VMEM on v5e (16 MiB), v6e (32 MiB), v7x (32 MiB).
MAX_BLOCK_ROWS = 4096


def _bce_sigmoid_kernel(x_ref, lbl_ref, out_ref, *, block_rows, valid_rows):
    x = x_ref[...].astype(jnp.float32)   # cast in-kernel; HBM carries native dtype
    lbl = lbl_ref[...]                   # any dtype; only compared against 0

    # target = (labels > 0), weight = (labels != 0)   (module semantics)
    target = (lbl > 0).astype(jnp.float32)

    # Numerically stable BCE-with-logits:
    #   max(x, 0) - x * target + log(1 + exp(-|x|))
    per_elem = (jnp.maximum(x, 0.0) - x * target
                + jnp.log1p(jnp.exp(-jnp.abs(x))))

    # weight==0 where labels==0 (also covers any lane padding, which uses 0 labels)
    valid = lbl != 0

    # Ragged last block: rows past the true row count hold undefined data.
    # Static trace-time check -> the iota/compare is only emitted when needed.
    if valid_rows % block_rows != 0:
        row_ids = (pl.program_id(0) * block_rows
                   + lax.broadcasted_iota(jnp.int32, x.shape, 0))
        valid = valid & (row_ids < valid_rows)

    masked = jnp.where(valid, per_elem, 0.0)

    # One lane-dense (1, 128) partial per grid step (row-axis reduce only).
    # The cross-lane reduce to a scalar happens once, outside the kernel.
    out_ref[...] = jnp.sum(masked, axis=0, keepdims=True)


def bce_sigmoid(x, labels, size_average=False):
    """Pallas equivalent of BCE_sigmoid.forward. Returns a scalar f32."""
    assert x.shape == labels.shape
    N = x.shape[0]

    x_flat = jnp.ravel(x)        # native dtype (f32/bf16 both fine)
    lbl_flat = jnp.ravel(labels)  # native dtype (f32/int8/... all fine)
    total = x_flat.shape[0]
    if total == 0:
        return jnp.float32(0.0)

    # Only wrapper-side data movement: pad the sub-128 lane remainder (if any)
    # with zero labels (zero weight). Never triggered when total % 128 == 0.
    rem = total % LANES
    if rem:
        pad = LANES - rem
        x_flat = jnp.pad(x_flat, (0, pad))
        lbl_flat = jnp.pad(lbl_flat, (0, pad))

    rows = x_flat.shape[0] // LANES
    x2d = x_flat.reshape(rows, LANES)
    lbl2d = lbl_flat.reshape(rows, LANES)

    block_rows = min(MAX_BLOCK_ROWS, rows)
    num_blocks = pl.cdiv(rows, block_rows)

    kernel = functools.partial(_bce_sigmoid_kernel,
                               block_rows=block_rows, valid_rows=rows)

    partials = pl.pallas_call(
        kernel,
        out_shape=jax.ShapeDtypeStruct((num_blocks, LANES), jnp.float32),
        grid_spec=pltpu.PrefetchScalarGridSpec(
            num_scalar_prefetch=0,
            grid=(num_blocks,),
            in_specs=[
                pl.BlockSpec((block_rows, LANES), lambda i: (i, 0)),
                pl.BlockSpec((block_rows, LANES), lambda i: (i, 0)),
            ],
            out_specs=pl.BlockSpec((1, LANES), lambda i: (i, 0)),
        ),
        compiler_params=pltpu.CompilerParams(
            # Independent per-block partials -> parallel axis; shards across
            # both TensorCores on v7x, harmless on single-TC v5e/v6e.
            dimension_semantics=("parallel",)),
    )(x2d, lbl2d)

    loss = jnp.sum(partials)  # single tiny cross-lane reduce, outside the kernel
    if size_average:
        loss = loss / N  # matches the PyTorch module: divide by batch size
    return loss


if __name__ == "__main__":
    key = jax.random.PRNGKey(0)
    k1, k2 = jax.random.split(key)

    # Small shapes consistent with the module (NCHW logits + same-shape labels).
    x = jax.random.normal(k1, (2, 4, 16, 16), dtype=jnp.float32)
    # labels in {-1, 0, 1}: 0 -> ignored (weight 0), >0 -> positive target
    labels = jax.random.randint(k2, (2, 4, 16, 16), -1, 2).astype(jnp.float32)

    loss = bce_sigmoid(x, labels, size_average=False)
    jax.block_until_ready(loss)

    # Pure-JAX reference check.
    mask = (labels != 0).astype(jnp.float32)
    target = (labels > 0).astype(jnp.float32)
    ref = jnp.sum(mask * (jnp.maximum(x, 0.0) - x * target
                          + jnp.log1p(jnp.exp(-jnp.abs(x)))))
    assert jnp.allclose(loss, ref, rtol=1e-5, atol=1e-5), (loss, ref)

    print("KERNEL_OK")
</pallas_src>

<mosaic_0001>
module attributes {stable_mosaic.version = 11 : i64} {
  func.func @_bce_sigmoid_kernel(%arg0: i32, %arg1: memref<16x128xf32, #tpu.memory_space<vmem>>, %arg2: memref<16x128xf32, #tpu.memory_space<vmem>>, %arg3: memref<1x128xf32, #tpu.memory_space<vmem>>) attributes {dimension_semantics = [#tpu.dimension_semantics<parallel>], iteration_bounds = array<i64: 1>, scalar_prefetch = 0 : i64, scratch_operands = 0 : i64, tpu.core_type = #tpu.core_type<tc>, window_params = [{transform_indices = @transform_0, window_bounds = array<i64: 16, 128>}, {transform_indices = @transform_1, window_bounds = array<i64: 16, 128>}, {transform_indices = @transform_2, window_bounds = array<i64: 1, 128>}]} {
    %c0 = arith.constant 0 : index
    %c0_0 = arith.constant 0 : index
    %0 = vector.load %arg1[%c0, %c0_0] : memref<16x128xf32, #tpu.memory_space<vmem>>, vector<16x128xf32>
    %c0_1 = arith.constant 0 : index
    %c0_2 = arith.constant 0 : index
    %1 = vector.load %arg2[%c0_1, %c0_2] : memref<16x128xf32, #tpu.memory_space<vmem>>, vector<16x128xf32>
    %cst = arith.constant 0.000000e+00 : f32
    %2 = vector.broadcast %cst : f32 to vector<16x128xf32>
    %3 = arith.cmpf ogt, %1, %2 : vector<16x128xf32>
    %4 = arith.extui %3 : vector<16x128xi1> to vector<16x128xi32>
    %5 = arith.sitofp %4 : vector<16x128xi32> to vector<16x128xf32>
    %cst_3 = arith.constant 0.000000e+00 : f32
    %6 = vector.broadcast %cst_3 : f32 to vector<16x128xf32>
    %7 = arith.maximumf %0, %6 : vector<16x128xf32>
    %8 = arith.mulf %0, %5 : vector<16x128xf32>
    %9 = arith.subf %7, %8 : vector<16x128xf32>
    %10 = math.absf %0 : vector<16x128xf32>
    %cst_4 = arith.constant 0.000000e+00 : f32
    %11 = vector.broadcast %cst_4 : f32 to vector<16x128xf32>
    %12 = arith.subf %11, %10 : vector<16x128xf32>
    %13 = math.exp %12 : vector<16x128xf32>
    %14 = math.log1p %13 : vector<16x128xf32>
    %15 = arith.addf %9, %14 : vector<16x128xf32>
    %cst_5 = arith.constant 0.000000e+00 : f32
    %16 = vector.broadcast %cst_5 : f32 to vector<16x128xf32>
    %17 = arith.cmpf one, %1, %16 : vector<16x128xf32>
    %cst_6 = arith.constant 0.000000e+00 : f32
    %18 = vector.broadcast %cst_6 : f32 to vector<16x128xf32>
    %19 = arith.select %17, %15, %18 : vector<16x128xi1>, vector<16x128xf32>
    %cst_7 = arith.constant dense<0.000000e+00> : vector<128xf32>
    %20 = vector.multi_reduction <add>, %19, %cst_7 [0] : vector<16x128xf32> to vector<128xf32>
    %21 = vector.shape_cast %20 : vector<128xf32> to vector<1x128xf32>
    %c0_8 = arith.constant 0 : index
    %c0_9 = arith.constant 0 : index
    %22 = vector.load %arg3[%c0_8, %c0_9] : memref<1x128xf32, #tpu.memory_space<vmem>>, vector<1x128xf32>
    tpu.vector_store %arg3[%c0_8, %c0_9], %21 {strides = array<i32>} : memref<1x128xf32, #tpu.memory_space<vmem>>, vector<1x128xf32>,
    return
  }
  func.func @transform_0(%arg0: i32) -> (i32, i32) {
    %c0_i32 = arith.constant 0 : i32
    %c0_i32_0 = arith.constant 0 : i32
    return %arg0, %c0_i32 : i32, i32
  }
  func.func @transform_1(%arg0: i32) -> (i32, i32) {
    %c0_i32 = arith.constant 0 : i32
    %c0_i32_0 = arith.constant 0 : i32
    return %arg0, %c0_i32 : i32, i32
  }
  func.func @transform_2(%arg0: i32) -> (i32, i32) {
    %c0_i32 = arith.constant 0 : i32
    %c0_i32_0 = arith.constant 0 : i32
    return %arg0, %c0_i32 : i32, i32
  }
}

</mosaic_0001>

<bundles_post_ra>
// kernel: tpu_custom_call.1
= control target key start
LH: loop header
LB: loop body
LE: loop exit
PB: predicated region body
PF: predicated region fallthrough
CT: control target
= control target key end

     0   :  { %7 = vsyncpa [#allocation3], 0  ;;  %s242_s0 = inlined_call_operand.hbm [shape: f32[16,128], index: 0, kind: input, shape index: {}]   ;;  %s243_s1 = inlined_call_operand.hbm [shape: f32[16,128], index: 1, kind: input, shape index: {}]   ;;  %s244_s2 = inlined_call_operand.hbm [shape: f32[1,128], index: 2, kind: output, shape index: {}]  }
   0x1   :  { %8 = vsyncpa [#allocation6], 0 }
   0x2   :  { %9 = vsyncpa [#allocation4], 0  ;;  %s14_s11 = sshll.u32 %s242_s0, 4  ;;  %s212_s12 = smov [#allocation2]   ;;  %s15_s11 = int_to_ptr.hbm [resolvable:$true] %s14_s11 }
   0x3   :  { %s16_s13 = sshll.u32 %s212_s12, 4  ;;  %s27_s16 = sshll.u32 %s243_s1, 4  ;;  %s17_s13 = int_to_ptr.vmem [resolvable:$true] %s16_s13  ;;  %s28_s16 = int_to_ptr.hbm [resolvable:$true] %s27_s16 }
   0x4   :  { %s213_s17 = smov 128   ;;  %s214_s18 = smov 8  }
   0x5   :  { %22 = dma.hbm_to_vmem [thread:$0]  %s15_s11, 256, %s17_s13, [#allocation3], %s213_s17, %s213_s17, %s214_s18  }
   0x6   :  { %s215_s19 = smov [#allocation5]  }
   0x7   :  { %s29_s20 = sshll.u32 %s215_s19, 4  ;;  %s30_s20 = int_to_ptr.vmem [resolvable:$true] %s29_s20 }
   0x8   :  { %35 = dma.hbm_to_vmem [thread:$0]  %s28_s16, 256, %s30_s20, [#allocation6], %s213_s17, %s213_s17, %s214_s18  }
   0x9   :  { %206 = dma.done.wait [#allocation3], 256  }
   0xa   :  { %207 = vsyncadd [#allocation3], 4294967040 }
   0xb   :  { %208 = dma.done.wait [#allocation6], 256  }
   0xc   :  { %209 = vsyncadd [#allocation6], 4294967040  ;;  %v44_v0 = vld [vmem:[#allocation2] sm:$0xff]  ;;  %v45_v1 = vld [vmem:[#allocation2 + $0x8] sm:$0xff]  ;;  %v216_v14 = vmov 0.0   ;;  %s217_s0 = smov [#allocation7]  }
   0xd   :  { %v60_v2 = vand.u32 2147483647, %v44_v0  ;;  %v61_v3 = vand.u32 2147483647, %v45_v1  ;;  %v46_v8 = vld [vmem:[#allocation5] sm:$0xff]  ;;  %v47_v9 = vld [vmem:[#allocation5 + $0x8] sm:$0xff] }
   0xe   :  { %vm48_vm0 = vcmp.gt.f32.partialorder %v46_v8, 0.0  ;;  %vm49_vm1 = vcmp.gt.f32.partialorder %v47_v9, 0.0  ;;  %v54_v20 = vmax.f32 %v44_v0, 0.0  ;;  %v55_v24 = vmax.f32 %v45_v1, 0.0  ;;  %s105_s1 = sshll.u32 %s217_s0, 4  ;;  %s107_s23 = sshll.u32 %s244_s2, 4  ;;  %s106_s1 = int_to_ptr.vmem [resolvable:$true] %s105_s1  ;;  %s108_s23 = int_to_ptr.hbm [resolvable:$true] %s107_s23 }
   0xf   :  { %v62_v4 = vsub.f32 0.0, %v60_v2  ;;  %v63_v5 = vsub.f32 0.0, %v61_v3  ;;  %v118_v15 = vsel %vm48_vm0, 1.0, %v216_v14  ;;  %v119_v18 = vsel %vm49_vm1, 1.0, %v216_v14 }
  0x10   :  { %v56_v21 = vmul.f32 %v118_v15, %v44_v0  ;;  %v57_v25 = vmul.f32 %v119_v18, %v45_v1  ;;  %vm88_vm4 = vcmp.ne.f32.partialorder %v46_v8, 0.0  ;;  %vm89_vm5 = vcmp.ne.f32.partialorder %v47_v9, 0.0 }
  0x11   :  { %v64_v6 = vmul.f32 1.442695, %v62_v4  ;;  %v66_v7 = vmul.f32 1.442695, %v63_v5 }
  0x12   :  { %v58_v29 = vsub.f32 %v54_v20, %v56_v21  ;;  %v59_v32 = vsub.f32 %v55_v24, %v57_v25 }
  0x13   :  { %126 = vpow2.f32 %v64_v6 }
  0x14   :  { %128 = vpow2.f32 %v66_v7 }
  0x19   :  { %v127_v10 = vpop.eup %126 }
  0x1a   :  { %v129_v11 = vpop.eup %128  ;;  %v68_v12 = vadd.f32 1.0, %v127_v10  ;;  %v71_v13 = vmul.f32 -0.5, %v127_v10  ;;  %v74_v22 = vand.u32 2147483647, %v127_v10 }
  0x1b   :  { %v77_v16 = vadd.f32 1.0, %v129_v11  ;;  %v80_v17 = vmul.f32 -0.5, %v129_v11  ;;  %v83_v26 = vand.u32 2147483647, %v129_v11 }
  0x1c   :  { %130 = vlog2.f32 %v68_v12  ;;  %v72_v19 = vadd.f32 1.0, %v71_v13  ;;  %vm75_vm2 = vcmp.lt.f32.partialorder %v74_v22, 0.0004427343 }
  0x1d   :  { %132 = vlog2.f32 %v77_v16  ;;  %v81_v23 = vadd.f32 1.0, %v80_v17  ;;  %vm84_vm3 = vcmp.lt.f32.partialorder %v83_v26, 0.0004427343 }
  0x1e   :  { %v73_v27 = vmul.f32 %v127_v10, %v72_v19 }
  0x1f   :  { %v82_v30 = vmul.f32 %v129_v11, %v81_v23 }
  0x22   :  { %v131_v28 = vpop.eup %130 }
  0x23   :  { %v133_v31 = vpop.eup %132  ;;  %v70_v33 = vmul.f32 0.6931472, %v131_v28 }
  0x24   :  { %v79_v34 = vmul.f32 0.6931472, %v133_v31 }
  0x25   :  { %v76_v35 = vsel %vm75_vm2, %v73_v27, %v70_v33 }
  0x26   :  { %v85_v36 = vsel %vm84_vm3, %v82_v30, %v79_v34  ;;  %v86_v37 = vadd.f32 %v76_v35, %v58_v29 }
  0x27   :  { %v87_v38 = vadd.f32 %v85_v36, %v59_v32 }
  0x28   :  { %v90_v39 = vsel %vm88_vm4, %v86_v37, 0.0 }
  0x29   :  { %v91_v40 = vsel %vm89_vm5, %v87_v38, 0.0 }
  0x2a   :  { %v92_v41 = vadd.f32 %v91_v40, %v90_v39 }
  0x2c   :  { %v93_v42 = vrot.slane %v92_v41, 4 }
  0x2e   :  { %v94_v43 = vadd.f32 %v93_v42, %v92_v41 }
  0x30   :  { %v95_v44 = vrot.slane %v94_v43, 2 }
  0x32   :  { %v96_v45 = vadd.f32 %v95_v44, %v94_v43 }
  0x34   :  { %v97_v46 = vrot.slane %v96_v45, 1 }
  0x36   :  { %v98_v47 = vadd.f32 %v97_v46, %v96_v45 }
  0x38   :  { %99 = vst [vmem:[#allocation7] sm:$0x1] %v98_v47 }
  0x39   :  { %110 = dma.vmem_to_hbm [thread:$0]  %s106_s1, 16, %s108_s23, [#allocation4]  }
  0x3a   :  { %210 = dma.done.wait [#allocation4], 16  }
  0x3b   :  { %211 = vsyncadd [#allocation4], 4294967280 }
  0x3c   :  { %115 = vsyncpa [#allocation3], 1 }
  0x3d   :  { %116 = vsyncpa [#allocation6], 1 }
  0x3e   :  { %117 = vsyncpa [#allocation4], 1 }

</bundles_post_ra>
